<compile_context>
chip_gen: v7x
topology: tpu7x:2x2x1
jax: 0.10.0
libtpu: 0.0.40
codegen_flags: <defaults>
</compile_context>

<pallas_src>
import math

import jax
import jax.numpy as jnp
from jax import lax
from jax.experimental import pallas as pl
from jax.experimental.pallas import tpu as pltpu


def _round_up(v, m):
    return (v + m - 1) // m * m


def _padded_vmem_bytes(shape, dtype_bytes=4):
    """Rough lane/sublane-padded VMEM footprint of a 2-D f32 block."""
    if len(shape) == 1:
        shape = (1,) + tuple(shape)
    rows = _round_up(shape[-2], 8)
    cols = _round_up(shape[-1], 128)
    lead = 1
    for s in shape[:-2]:
        lead *= s
    return lead * rows * cols * dtype_bytes


def _block_diag(w, G):
    """Block-diagonal replication of a 2-D weight, G copies along the diagonal."""
    r, c = w.shape
    out = jnp.zeros((G * r, G * c), dtype=w.dtype)
    for g in range(G):
        out = out.at[g * r:(g + 1) * r, g * c:(g + 1) * c].set(w)
    return out


def _fourier_pe_kernel(x_ref, wr_ref, w1c_ref, w1s_ref, b1_ref, w2_ref, b2_ref,
                       o_ref):
    # x_ref:   (TILE_N, G*M)        row tile of positions (groups along lanes)
    # wr_ref:  (G*M, G*F_half)      block-diag Wr.T
    # w1c_ref: (G*F_half, G*H)      block-diag cos-half of W1.T (scale folded)
    # w1s_ref: (G*F_half, G*H)      block-diag sin-half of W1.T (scale folded)
    # b1_ref:  (1, G*H)
    # w2_ref:  (G*H, D)             block-diag W2.T
    # b2_ref:  (1, D)
    # o_ref:   (TILE_N, D)          lane-dense output tile
    prec = lax.Precision.HIGHEST
    inv_sqrt2 = jnp.float32(1.0 / math.sqrt(2.0))

    proj = jnp.dot(x_ref[...], wr_ref[...],
                   preferred_element_type=jnp.float32, precision=prec)
    # (1/sqrt(F_dim)) * [cos | sin] @ W1.T without materializing the concat:
    h = (jnp.dot(jnp.cos(proj), w1c_ref[...],
                 preferred_element_type=jnp.float32, precision=prec)
         + jnp.dot(jnp.sin(proj), w1s_ref[...],
                   preferred_element_type=jnp.float32, precision=prec)
         + b1_ref[...])
    # exact GELU (PyTorch nn.GELU default): 0.5 * x * (1 + erf(x / sqrt(2)))
    h = 0.5 * h * (1.0 + lax.erf(h * inv_sqrt2))
    y = jnp.dot(h, w2_ref[...],
                preferred_element_type=jnp.float32, precision=prec) + b2_ref[...]
    o_ref[...] = y.astype(o_ref.dtype)


def learnable_fourier_pe(x, wr, w1, b1, w2, b2, *, G, D, tile_n=4096):
    """x: (N, G, M) float32.  Returns PEx: (N, D) float32."""
    N, G_in, M = x.shape
    assert G_in == G
    F_half, M_in = wr.shape
    assert M_in == M
    F_dim = 2 * F_half
    H = w1.shape[0]
    d_over_g = D // G
    assert w2.shape == (d_over_g, H)
    assert d_over_g * G == D

    # ---- wrapper-side weight prep (one-time cost) ------------------------
    scale = jnp.float32(1.0 / math.sqrt(F_dim))
    wr_t = jnp.asarray(wr).T                       # (M, F_half)
    w1_t = jnp.asarray(w1).T * scale               # (F_dim, H), scale folded in
    w1c_t = w1_t[:F_half]                          # (F_half, H) -> cos path
    w1s_t = w1_t[F_half:]                          # (F_half, H) -> sin path
    w2_t = jnp.asarray(w2).T                       # (H, D//G)

    # Block-diagonal consolidation over groups (review opt #1).
    wr_bd = _block_diag(wr_t, G)                   # (G*M, G*F_half)
    w1c_bd = _block_diag(w1c_t, G)                 # (G*F_half, G*H)
    w1s_bd = _block_diag(w1s_t, G)                 # (G*F_half, G*H)
    w2_bd = _block_diag(w2_t, G)                   # (G*H, D)
    b1_bd = jnp.tile(jnp.asarray(b1).reshape(1, H), (1, G))        # (1, G*H)
    b2_bd = jnp.tile(jnp.asarray(b2).reshape(1, d_over_g), (1, G)) # (1, D)

    # Row-tile layout: positions flattened to (N, G*M), output emitted (N, D).
    x2 = x.reshape(N, G * M)
    n8 = _round_up(N, 8)
    tile_n = _round_up(max(8, min(int(tile_n), n8)), 8)
    # v7x megacore: prefer >= 2 row-grid steps so "parallel" can use both TCs.
    if n8 // tile_n < 2 and n8 >= 16:
        tile_n = _round_up(-(-n8 // 2), 8)
    n_pad = _round_up(n8, tile_n)
    if n_pad != N:
        x2 = jnp.pad(x2, ((0, n_pad - N), (0, 0)))
    grid = (n_pad // tile_n,)

    const_spec = lambda shape: pl.BlockSpec(shape, lambda i: (0, 0))

    # ---- VMEM budget (double-buffered tiles + resident weights) ----------
    vmem_est = (
        2 * _padded_vmem_bytes((tile_n, G * M))
        + 2 * _padded_vmem_bytes((tile_n, D))
        + 2 * sum(_padded_vmem_bytes(a.shape)
                  for a in (wr_bd, w1c_bd, w1s_bd, b1_bd, w2_bd, b2_bd))
    )
    # Generation-aware cap: never request the full per-TC VMEM (64 MiB on v7x).
    try:
        vmem_cap = int(pltpu.get_tpu_info().vmem_capacity_bytes)
    except Exception:
        vmem_cap = 64 << 20          # assume smallest (v7x per-TC) if unknown
    vmem_limit = int(min(vmem_est + (8 << 20), max(vmem_cap - (16 << 20), 32 << 20)))

    # ---- advisory cost estimate for XLA scheduling ------------------------
    flops = 2 * N * G * (M * F_half + F_dim * H + H * d_over_g)
    transcendentals = N * G * (F_dim + H)          # cos + sin + erf
    bytes_accessed = 4 * (
        n_pad * G * M + wr_bd.size + w1c_bd.size + w1s_bd.size
        + b1_bd.size + w2_bd.size + b2_bd.size + n_pad * D
    )

    out = pl.pallas_call(
        _fourier_pe_kernel,
        out_shape=jax.ShapeDtypeStruct((n_pad, D), jnp.float32),
        grid=grid,
        in_specs=[
            pl.BlockSpec((tile_n, G * M), lambda i: (i, 0)),   # row tile of x
            const_spec(wr_bd.shape),                           # resident weights
            const_spec(w1c_bd.shape),
            const_spec(w1s_bd.shape),
            const_spec(b1_bd.shape),
            const_spec(w2_bd.shape),
            const_spec(b2_bd.shape),
        ],
        out_specs=pl.BlockSpec((tile_n, D), lambda i: (i, 0)),  # lane-dense out
        compiler_params=pltpu.CompilerParams(
            dimension_semantics=("parallel",),
            vmem_limit_bytes=vmem_limit,
        ),
        cost_estimate=pl.CostEstimate(
            flops=int(flops),
            transcendentals=int(transcendentals),
            bytes_accessed=int(bytes_accessed),
        ),
    )(x2, wr_bd, w1c_bd, w1s_bd, b1_bd, w2_bd, b2_bd)

    if n_pad != N:
        out = out[:N]
    return out


def _reference(x, wr, w1, b1, w2, b2, *, G, D, F_dim):
    # Pure-JAX reference (mirrors the PyTorch module), fp32 matmul precision.
    hi = lax.Precision.HIGHEST
    proj = jnp.einsum("ngm,fm->ngf", x, wr, precision=hi)
    feats = (1.0 / math.sqrt(F_dim)) * jnp.concatenate(
        [jnp.cos(proj), jnp.sin(proj)], axis=-1
    )
    h = jnp.einsum("ngf,hf->ngh", feats, w1, precision=hi) + b1
    h = 0.5 * h * (1.0 + lax.erf(h / jnp.sqrt(2.0)))
    y = jnp.einsum("ngh,dh->ngd", h, w2, precision=hi) + b2
    return y.reshape(x.shape[0], D)


if __name__ == "__main__":
    # Module hyperparameters (small but consistent with the forward semantics).
    G, M = 2, 4
    F_dim, H_dim = 32, 32
    D = 64
    gamma = 10.0
    N = 8  # batch / number of tokens

    key = jax.random.PRNGKey(0)
    kx, kwr, kw1, kb1, kw2, kb2 = jax.random.split(key, 6)

    # Input positions: (N, G, M)
    x = jax.random.normal(kx, (N, G, M), dtype=jnp.float32)

    # Parameters (Wr ~ N(0, gamma^-2) per the module's init_weights).
    wr = (gamma ** -2) * jax.random.normal(kwr, (F_dim // 2, M), dtype=jnp.float32)
    w1 = 0.1 * jax.random.normal(kw1, (H_dim, F_dim), dtype=jnp.float32)
    b1 = 0.1 * jax.random.normal(kb1, (H_dim,), dtype=jnp.float32)
    w2 = 0.1 * jax.random.normal(kw2, (D // G, H_dim), dtype=jnp.float32)
    b2 = 0.1 * jax.random.normal(kb2, (D // G,), dtype=jnp.float32)

    pex = learnable_fourier_pe(x, wr, w1, b1, w2, b2, G=G, D=D)
    pex = jax.block_until_ready(pex)

    ref = _reference(x, wr, w1, b1, w2, b2, G=G, D=D, F_dim=F_dim)
    assert pex.shape == (N, D), pex.shape
    assert jnp.allclose(pex, ref, atol=2e-5, rtol=2e-5), "mismatch vs reference"

    print("KERNEL_OK")
</pallas_src>

<mosaic_0001>
module attributes {stable_mosaic.version = 11 : i64} {
  func.func @_fourier_pe_kernel(%arg0: i32, %arg1: memref<8x8xf32, #tpu.memory_space<vmem>>, %arg2: memref<8x32xf32, #tpu.memory_space<vmem>>, %arg3: memref<32x64xf32, #tpu.memory_space<vmem>>, %arg4: memref<32x64xf32, #tpu.memory_space<vmem>>, %arg5: memref<1x64xf32, #tpu.memory_space<vmem>>, %arg6: memref<64x64xf32, #tpu.memory_space<vmem>>, %arg7: memref<1x64xf32, #tpu.memory_space<vmem>>, %arg8: memref<8x64xf32, #tpu.memory_space<vmem>>) attributes {dimension_semantics = [#tpu.dimension_semantics<parallel>], iteration_bounds = array<i64: 1>, scalar_prefetch = 0 : i64, scratch_operands = 0 : i64, tpu.core_type = #tpu.core_type<tc>, window_params = [{transform_indices = @transform_0, window_bounds = array<i64: 8, 8>}, {pipeline_mode = #tpu.pipeline_mode<synchronous>, transform_indices = @transform_1, window_bounds = array<i64: 8, 32>}, {pipeline_mode = #tpu.pipeline_mode<synchronous>, transform_indices = @transform_2, window_bounds = array<i64: 32, 64>}, {pipeline_mode = #tpu.pipeline_mode<synchronous>, transform_indices = @transform_3, window_bounds = array<i64: 32, 64>}, {pipeline_mode = #tpu.pipeline_mode<synchronous>, transform_indices = @transform_4, window_bounds = array<i64: 1, 64>}, {pipeline_mode = #tpu.pipeline_mode<synchronous>, transform_indices = @transform_5, window_bounds = array<i64: 64, 64>}, {pipeline_mode = #tpu.pipeline_mode<synchronous>, transform_indices = @transform_6, window_bounds = array<i64: 1, 64>}, {transform_indices = @transform_7, window_bounds = array<i64: 8, 64>}]} {
    %c0 = arith.constant 0 : index
    %c0_0 = arith.constant 0 : index
    %0 = vector.load %arg1[%c0, %c0_0] : memref<8x8xf32, #tpu.memory_space<vmem>>, vector<8x8xf32>
    %c0_1 = arith.constant 0 : index
    %c0_2 = arith.constant 0 : index
    %1 = vector.load %arg2[%c0_1, %c0_2] : memref<8x32xf32, #tpu.memory_space<vmem>>, vector<8x32xf32>
    %cst = arith.constant dense<0.000000e+00> : vector<8x32xf32>
    %2 = tpu.matmul %0, %1, %cst {dimension_numbers = #tpu.dot_dimension_numbers<[1], [0], [0], [1], [0, 0, 1, 1], [], []>, precision = #tpu.contract_precision<fp32>} : vector<8x8xf32>, vector<8x32xf32>, vector<8x32xf32> -> vector<8x32xf32>
    %3 = math.cos %2 : vector<8x32xf32>
    %c0_3 = arith.constant 0 : index
    %c0_4 = arith.constant 0 : index
    %4 = vector.load %arg3[%c0_3, %c0_4] : memref<32x64xf32, #tpu.memory_space<vmem>>, vector<32x64xf32>
    %cst_5 = arith.constant dense<0.000000e+00> : vector<8x64xf32>
    %5 = tpu.matmul %3, %4, %cst_5 {dimension_numbers = #tpu.dot_dimension_numbers<[1], [0], [0], [1], [0, 0, 1, 1], [], []>, precision = #tpu.contract_precision<fp32>} : vector<8x32xf32>, vector<32x64xf32>, vector<8x64xf32> -> vector<8x64xf32>
    %6 = math.sin %2 : vector<8x32xf32>
    %c0_6 = arith.constant 0 : index
    %c0_7 = arith.constant 0 : index
    %7 = vector.load %arg4[%c0_6, %c0_7] : memref<32x64xf32, #tpu.memory_space<vmem>>, vector<32x64xf32>
    %cst_8 = arith.constant dense<0.000000e+00> : vector<8x64xf32>
    %8 = tpu.matmul %6, %7, %cst_8 {dimension_numbers = #tpu.dot_dimension_numbers<[1], [0], [0], [1], [0, 0, 1, 1], [], []>, precision = #tpu.contract_precision<fp32>} : vector<8x32xf32>, vector<32x64xf32>, vector<8x64xf32> -> vector<8x64xf32>
    %9 = arith.addf %5, %8 : vector<8x64xf32>
    %c0_9 = arith.constant 0 : index
    %c0_10 = arith.constant 0 : index
    %10 = vector.load %arg5[%c0_9, %c0_10] : memref<1x64xf32, #tpu.memory_space<vmem>>, vector<1x64xf32>
    %11 = vector.broadcast %10 : vector<1x64xf32> to vector<8x64xf32>
    %12 = arith.addf %9, %11 : vector<8x64xf32>
    %cst_11 = arith.constant 5.000000e-01 : f32
    %13 = vector.broadcast %cst_11 : f32 to vector<8x64xf32>
    %14 = arith.mulf %13, %12 : vector<8x64xf32>
    %cst_12 = arith.constant 0.707106769 : f32
    %15 = vector.broadcast %cst_12 : f32 to vector<8x64xf32>
    %16 = arith.mulf %12, %15 : vector<8x64xf32>
    %17 = math.erf %16 : vector<8x64xf32>
    %cst_13 = arith.constant 1.000000e+00 : f32
    %18 = vector.broadcast %cst_13 : f32 to vector<8x64xf32>
    %19 = arith.addf %18, %17 : vector<8x64xf32>
    %20 = arith.mulf %14, %19 : vector<8x64xf32>
    %c0_14 = arith.constant 0 : index
    %c0_15 = arith.constant 0 : index
    %21 = vector.load %arg6[%c0_14, %c0_15] : memref<64x64xf32, #tpu.memory_space<vmem>>, vector<64x64xf32>
    %cst_16 = arith.constant dense<0.000000e+00> : vector<8x64xf32>
    %22 = tpu.matmul %20, %21, %cst_16 {dimension_numbers = #tpu.dot_dimension_numbers<[1], [0], [0], [1], [0, 0, 1, 1], [], []>, precision = #tpu.contract_precision<fp32>} : vector<8x64xf32>, vector<64x64xf32>, vector<8x64xf32> -> vector<8x64xf32>
    %c0_17 = arith.constant 0 : index
    %c0_18 = arith.constant 0 : index
    %23 = vector.load %arg7[%c0_17, %c0_18] : memref<1x64xf32, #tpu.memory_space<vmem>>, vector<1x64xf32>
    %24 = vector.broadcast %23 : vector<1x64xf32> to vector<8x64xf32>
    %25 = arith.addf %22, %24 : vector<8x64xf32>
    %c0_19 = arith.constant 0 : index
    %c0_20 = arith.constant 0 : index
    %26 = vector.load %arg8[%c0_19, %c0_20] : memref<8x64xf32, #tpu.memory_space<vmem>>, vector<8x64xf32>
    tpu.vector_store %arg8[%c0_19, %c0_20], %25 {strides = array<i32>} : memref<8x64xf32, #tpu.memory_space<vmem>>, vector<8x64xf32>,
    return
  }
  func.func @transform_0(%arg0: i32) -> (i32, i32) {
    %c0_i32 = arith.constant 0 : i32
    %c0_i32_0 = arith.constant 0 : i32
    return %arg0, %c0_i32 : i32, i32
  }
  func.func @transform_1(%arg0: i32) -> (i32, i32) {
    %c0_i32 = arith.constant 0 : i32
    %c0_i32_0 = arith.constant 0 : i32
    %c0_i32_1 = arith.constant 0 : i32
    return %c0_i32, %c0_i32_0 : i32, i32
  }
  func.func @transform_2(%arg0: i32) -> (i32, i32) {
    %c0_i32 = arith.constant 0 : i32
    %c0_i32_0 = arith.constant 0 : i32
    %c0_i32_1 = arith.constant 0 : i32
    return %c0_i32, %c0_i32_0 : i32, i32
  }
  func.func @transform_3(%arg0: i32) -> (i32, i32) {
    %c0_i32 = arith.constant 0 : i32
    %c0_i32_0 = arith.constant 0 : i32
    %c0_i32_1 = arith.constant 0 : i32
    return %c0_i32, %c0_i32_0 : i32, i32
  }
  func.func @transform_4(%arg0: i32) -> (i32, i32) {
    %c0_i32 = arith.constant 0 : i32
    %c0_i32_0 = arith.constant 0 : i32
    %c0_i32_1 = arith.constant 0 : i32
    return %c0_i32, %c0_i32_0 : i32, i32
  }
  func.func @transform_5(%arg0: i32) -> (i32, i32) {
    %c0_i32 = arith.constant 0 : i32
    %c0_i32_0 = arith.constant 0 : i32
    %c0_i32_1 = arith.constant 0 : i32
    return %c0_i32, %c0_i32_0 : i32, i32
  }
  func.func @transform_6(%arg0: i32) -> (i32, i32) {
    %c0_i32 = arith.constant 0 : i32
    %c0_i32_0 = arith.constant 0 : i32
    %c0_i32_1 = arith.constant 0 : i32
    return %c0_i32, %c0_i32_0 : i32, i32
  }
  func.func @transform_7(%arg0: i32) -> (i32, i32) {
    %c0_i32 = arith.constant 0 : i32
    %c0_i32_0 = arith.constant 0 : i32
    return %arg0, %c0_i32 : i32, i32
  }
}

</mosaic_0001>

<bundles_post_ra>
// kernel: tpu_custom_call.1
= control target key start
LH: loop header
LB: loop body
LE: loop exit
PB: predicated region body
PF: predicated region fallthrough
CT: control target
= control target key end

     0   :  { %12 = vsyncpa [#allocation3], 0  ;;  %s3557_s0 = inlined_call_operand.hbm [shape: f32[8,8], index: 0, kind: input, shape index: {}]   ;;  %s3558_s1 = inlined_call_operand.hbm [shape: f32[8,32], index: 1, kind: input, shape index: {}]   ;;  %s3559_s2 = inlined_call_operand.hbm [shape: f32[32,64], index: 2, kind: input, shape index: {}]   ;;  %s3560_s3 = inlined_call_operand.hbm [shape: f32[32,64], index: 3, kind: input, shape index: {}]   ;;  %s3561_s4 = inlined_call_operand.vmem [shape: f32[1,64], index: 4, kind: input, shape index: {}]   ;;  %s3562_s5 = inlined_call_operand.hbm [shape: f32[64,64], index: 5, kind: input, shape index: {}]   ;;  %s3563_s6 = inlined_call_operand.vmem [shape: f32[1,64], index: 6, kind: input, shape index: {}]   ;;  %s3564_s7 = inlined_call_operand.hbm [shape: f32[8,64], index: 7, kind: output, shape index: {}]  }
   0x1   :  { %13 = vsyncpa [#allocation6], 0 }
   0x2   :  { %14 = vsyncpa [#allocation9], 0 }
   0x3   :  { %15 = vsyncpa [#allocation4], 0  ;;  %s3064_s24 = smov [#allocation5]   ;;  %s2924_s28 = scalar_lea.hbm %s3558_s1, 128 }
   0x4   :  { %s32_s25 = sshll.u32 %s3064_s24, 4  ;;  %p2925_p0 = scmp.ne.s32.totalorder %s3558_s1, %s2924_s28  ;;  %s33_s25 = int_to_ptr.vmem [resolvable:$true] %s32_s25 }
   0x5   :  { %p2928_p1 = scmp.lt.u32.totalorder %s2924_s28, %s3558_s1 }
   0x7   :  { %p2930_p2 = pnand %p2928_p1, %p2925_p0 }
   0x9   :  { %2933 = shalt.err (!%p2930_p2)
}
   0xa   :  { %s2934_s10 = scalar_lea.vmem %s33_s25, 128  ;;  %p2939_p4 = scmp.lt.s32.totalorder %s33_s25, %s33_s25 }
   0xb   :  { %p2935_p3 = scmp.ne.s32.totalorder %s33_s25, %s2934_s10  ;;  %p2940_p5 = scmp.lt.s32.totalorder %s2934_s10, %s2934_s10 }
   0xd   :  { %p2941_p6 = por %p2940_p5, %p2939_p4 }
   0xf   :  { %p2942_p7 = pnand %p2941_p6, %p2935_p3 }
  0x11   :  { %2945 = shalt.err (!%p2942_p7)
}
  0x12   :  { %35 = dma.hbm_to_vmem [thread:$0]  %s3558_s1, 128, %s33_s25, [#allocation6]  }
  0x13   :  { %s3065_s13 = smov [#allocation8]   ;;  %s3066_s15 = smov [#allocation2]  }
  0x14   :  { %s53_s14 = sshll.u32 %s3065_s13, 4  ;;  %s22_s16 = sshll.u32 %s3066_s15, 4  ;;  %s54_s14 = int_to_ptr.vmem [resolvable:$true] %s53_s14  ;;  %s23_s16 = int_to_ptr.vmem [resolvable:$true] %s22_s16 }
  0x15   :  { %s2946_s19 = scalar_lea.hbm %s3560_s3, 512 }
  0x16   :  { %p2947_p8 = scmp.ne.s32.totalorder %s3560_s3, %s2946_s19  ;;  %p2950_p9 = scmp.lt.u32.totalorder %s2946_s19, %s3560_s3 }
  0x18   :  { %p2952_p10 = pnand %p2950_p9, %p2947_p8 }
  0x1a   :  { %2955 = shalt.err (!%p2952_p10)
}
  0x1b   :  { %s2956_s1 = scalar_lea.vmem %s54_s14, 512  ;;  %p2961_p12 = scmp.lt.s32.totalorder %s54_s14, %s54_s14 }
  0x1c   :  { %p2957_p11 = scmp.ne.s32.totalorder %s54_s14, %s2956_s1  ;;  %p2962_p13 = scmp.lt.s32.totalorder %s2956_s1, %s2956_s1 }
  0x1e   :  { %p2963_p0 = por %p2962_p13, %p2961_p12 }
  0x20   :  { %p2964_p1 = pnand %p2963_p0, %p2957_p11 }
  0x22   :  { %2967 = shalt.err (!%p2964_p1)
}
  0x23   :  { %s3067_s24 = smov 128   ;;  %s3068_s25 = smov 8  }
  0x24   :  { %59 = dma.hbm_to_vmem [thread:$0]  %s3560_s3, 512, %s54_s14, [#allocation9], %s3067_s24, %s3067_s24, %s3068_s25  }
  0x25   :  { %s2968_s30 = scalar_lea.hbm %s3557_s0, 128 }
  0x26   :  { %p2969_p2 = scmp.ne.s32.totalorder %s3557_s0, %s2968_s30  ;;  %p2972_p3 = scmp.lt.u32.totalorder %s2968_s30, %s3557_s0 }
  0x28   :  { %p2974_p4 = pnand %p2972_p3, %p2969_p2 }
  0x2a   :  { %2977 = shalt.err (!%p2974_p4)
}
  0x2b   :  { %s2978_s12 = scalar_lea.vmem %s23_s16, 128  ;;  %p2983_p6 = scmp.lt.s32.totalorder %s23_s16, %s23_s16 }
  0x2c   :  { %p2979_p5 = scmp.ne.s32.totalorder %s23_s16, %s2978_s12  ;;  %p2984_p7 = scmp.lt.s32.totalorder %s2978_s12, %s2978_s12 }
  0x2e   :  { %p2985_p8 = por %p2984_p7, %p2983_p6 }
  0x30   :  { %p2986_p9 = pnand %p2985_p8, %p2979_p5 }
  0x32   :  { %2989 = shalt.err (!%p2986_p9)
}
  0x33   :  { %25 = dma.hbm_to_vmem [thread:$0]  %s3557_s0, 128, %s23_s16, [#allocation3]  }
  0x34   :  { %s3069_s14 = smov [#allocation7]   ;;  %s3070_s17 = smov [#allocation10]  }
  0x35   :  { %s41_s15 = sshll.u32 %s3069_s14, 4  ;;  %s67_s18 = sshll.u32 %s3070_s17, 4  ;;  %s42_s15 = int_to_ptr.vmem [resolvable:$true] %s41_s15  ;;  %s68_s18 = int_to_ptr.vmem [resolvable:$true] %s67_s18 }
  0x36   :  { %s2990_s21 = scalar_lea.hbm %s3559_s2, 512 }
  0x37   :  { %p2991_p10 = scmp.ne.s32.totalorder %s3559_s2, %s2990_s21  ;;  %p2994_p11 = scmp.lt.u32.totalorder %s2990_s21, %s3559_s2 }
  0x39   :  { %p2996_p12 = pnand %p2994_p11, %p2991_p10 }
  0x3b   :  { %2999 = shalt.err (!%p2996_p12)
}
  0x3c   :  { %s3000_s0 = scalar_lea.vmem %s42_s15, 512  ;;  %p3005_p0 = scmp.lt.s32.totalorder %s42_s15, %s42_s15 }
  0x3d   :  { %p3001_p13 = scmp.ne.s32.totalorder %s42_s15, %s3000_s0  ;;  %p3006_p1 = scmp.lt.s32.totalorder %s3000_s0, %s3000_s0 }
  0x3f   :  { %p3007_p2 = por %p3006_p1, %p3005_p0 }
  0x41   :  { %p3008_p3 = pnand %p3007_p2, %p3001_p13 }
  0x43   :  { %3011 = shalt.err (!%p3008_p3)
}
  0x44   :  { %47 = dma.hbm_to_vmem [thread:$0]  %s3559_s2, 512, %s42_s15, [#allocation6], %s3067_s24, %s3067_s24, %s3068_s25  }
  0x45   :  { %s3012_s30 = scalar_lea.hbm %s3562_s5, 1024 }
  0x46   :  { %p3013_p4 = scmp.ne.s32.totalorder %s3562_s5, %s3012_s30  ;;  %p3016_p5 = scmp.lt.u32.totalorder %s3012_s30, %s3562_s5 }
  0x48   :  { %p3018_p6 = pnand %p3016_p5, %p3013_p4 }
  0x4a   :  { %3021 = shalt.err (!%p3018_p6)
}
  0x4b   :  { %s3022_s12 = scalar_lea.vmem %s68_s18, 1024  ;;  %p3027_p8 = scmp.lt.s32.totalorder %s68_s18, %s68_s18 }
  0x4c   :  { %p3023_p7 = scmp.ne.s32.totalorder %s68_s18, %s3022_s12  ;;  %p3028_p9 = scmp.lt.s32.totalorder %s3022_s12, %s3022_s12 }
  0x4e   :  { %p3029_p10 = por %p3028_p9, %p3027_p8 }
  0x50   :  { %p3030_p11 = pnand %p3029_p10, %p3023_p7 }
  0x52   :  { %3033 = shalt.err (!%p3030_p11)
}
  0x53   :  { %73 = dma.hbm_to_vmem [thread:$0]  %s3562_s5, 1024, %s68_s18, [#allocation9], %s3067_s24, %s3067_s24, %s3068_s25  }
  0x54   :  { %3056 = dma.done.wait [#allocation3], 128  }
  0x55   :  { %3057 = vsyncadd [#allocation3], 4294967168 }
  0x56   :  { %3058 = dma.done.wait [#allocation6], 640  }
  0x57   :  { %3059 = vsyncadd [#allocation6], 4294966656 }
  0x58   :  { %3060 = dma.done.wait [#allocation9], 1536  }
  0x59   :  { %3061 = vsyncadd [#allocation9], 4294965760  ;;  %v3071_v0 = vmov 0.0   ;;  %vm3072_vm0 = vmmov 0   ;;  %vm93_vm1 = vcmask 64512   ;;  %v92_v1 = vld [vmem:[#allocation5] sm:$0xff] }
  0x5a   :  { %2463 = vmatprep.subr.mxu0 %v3071_v0  ;;  %2465 = vmatprep.mubr.msk.f32.mxu0 %vm3072_vm0, %v3071_v0  ;;  %v91_v2 = vld [vmem:[#allocation2] sm:$0xff]  ;;  %v98_v3 = vand.u32 4294901760, %v92_v1  ;;  %v754_v14 = vld [vmem:[#allocation8] sm:$0xff]  ;;  %v755_v15 = vld [vmem:[#allocation8 + $0x8] sm:$0xff]  ;;  %v3073_v17 = vmov 0.0|0.0   ;;  %vm758_vm14 = vcmask 261120  }
  0x5b   :  { %2458 = vmatprep.subr.mxu1 %v3071_v0  ;;  %2460 = vmatprep.mubr.msk.f32.mxu1 %vm3072_vm0, %v3071_v0  ;;  %v95_v4 = vsel %vm93_vm1, %v91_v2, 0  ;;  %v756_v16 = vld [vmem:[#allocation8 + $0x10] sm:$0xff]  ;;  %v763_v18 = vand.u32 4294901760, %v754_v14  ;;  %v766_v19 = vand.u32 4294901760, %v755_v15  ;;  %v757_v20 = vld [vmem:[#allocation8 + $0x18] sm:$0xff]  ;;  %s3080_s13 = smov [#allocation11]  }
  0x5c   :  { %v163_v5 = vand.u32 4294901760, %v95_v4  ;;  %v175_v6 = vsub.f32 %v92_v1, %v98_v3  ;;  %2459 = vmatpush3.msra.mxu1 %v98_v3  ;;  %v769_v21 = vand.u32 4294901760, %v756_v16  ;;  %v772_v22 = vand.u32 4294901760, %v757_v20  ;;  %s2311_s14 = sshll.u32 %s3080_s13, 4  ;;  %s2312_s14 = int_to_ptr.vmem [resolvable:$true] %s2311_s14 }
  0x5d   :  { %2734 = vmatprep.subr.bf16.mxu1 %v3073_v17  ;;  %v3214_v23 = vpack.c.bf16 %v766_v19, %v763_v18  ;;  %v3216_v24 = vsub.f32 %v754_v14, %v763_v18  ;;  %v3218_v25 = vsub.f32 %v755_v15, %v766_v19  ;;  %v3074_v62 = vmov 683565275   ;;  %s3034_s15 = scalar_lea.vmem %s2312_s14, 128  ;;  %p3039_p13 = scmp.lt.s32.totalorder %s2312_s14, %s2312_s14 }
  0x5e   :  { %v164_v7 = vsub.f32 %v95_v4, %v163_v5  ;;  %v176_v8 = vand.u32 4294901760, %v175_v6  ;;  %v3220_v26 = vsub.f32 %v756_v16, %v769_v21  ;;  %v3222_v27 = vsub.f32 %v757_v20, %v772_v22  ;;  %p3035_p12 = scmp.ne.s32.totalorder %s2312_s14, %s3034_s15  ;;  %p3040_p0 = scmp.lt.s32.totalorder %s3034_s15, %s3034_s15 }
  0x5f   :  { %v3226_v28 = vpack.c.bf16 %v772_v22, %v769_v21  ;;  %v844_v29 = vand.u32 4294901760, %v3216_v24  ;;  %v851_v30 = vand.u32 4294901760, %v3218_v25  ;;  %v2747_v45 = vpack.c.bf16 %v3218_v25, %v3216_v24 }
  0x60   :  { %v165_v9 = vand.u32 4294901760, %v164_v7  ;;  %v177_v10 = vsub.f32 %v175_v6, %v176_v8  ;;  %v858_v35 = vand.u32 4294901760, %v3220_v26  ;;  %v865_v36 = vand.u32 4294901760, %v3222_v27  ;;  %p3041_p1 = por %p3040_p0, %p3039_p13 }
  0x61   :  { %v845_v31 = vsub.f32 %v3216_v24, %v844_v29  ;;  %v852_v32 = vsub.f32 %v3218_v25, %v851_v30  ;;  %v2750_v46 = vpack.c.bf16 %v3222_v27, %v3220_v26  ;;  %v3250_v47 = vpack.c.bf16 %v851_v30, %v844_v29 }
  0x62   :  { %v166_v11 = vsub.f32 %v164_v7, %v165_v9  ;;  %v178_v12 = vand.u32 4294901760, %v177_v10  ;;  %v859_v38 = vsub.f32 %v3220_v26, %v858_v35  ;;  %v866_v39 = vsub.f32 %v3222_v27, %v865_v36  ;;  %p3042_p2 = pnand %p3041_p1, %p3035_p12 }
  0x63   :  { %v846_v33 = vand.u32 4294901760, %v845_v31  ;;  %v853_v34 = vand.u32 4294901760, %v852_v32  ;;  %v3252_v48 = vpack.c.bf16 %v865_v36, %v858_v35  ;;  %v3075_v1 = vmov 2475754826  }
  0x64   :  { %v167_v13 = vand.u32 4294901760, %v166_v11  ;;  %2464 = vmatpush3.msra.mxu0 %v178_v12  ;;  %v860_v40 = vand.u32 4294901760, %v859_v38  ;;  %v867_v41 = vand.u32 4294901760, %v866_v39  ;;  %v3076_v4 = vmov 2131351028  }
  0x65   :  { %2466 = vmatmul.mubr.f32.vlgmr.msra.gmra.mrb[0].mxu0 %v163_v5  ;;  %2468 = vmatprep.subr.mxu0 %v3071_v0  ;;  %v3240_v37 = vpack.c.bf16 %v853_v34, %v846_v33  ;;  %v3078_v10 = vmov 920167782  }
  0x66   :  { %2469 = vmatpush3.msra.mxu0 %v175_v6  ;;  %2470 = vmatprep.mubr.msk.f32.mxu0 %vm3072_vm0, %v3071_v0  ;;  %v3244_v44 = vpack.c.bf16 %v867_v41, %v860_v40 }
  0x67   :  { %2473 = vmatprep.subr.mxu0 %v3071_v0  ;;  %2461 = vmatmul.mubr.f32.vlgmr.msra.gmra.mrb[0].mxu1 %v167_v13  ;;  %v3079_v13 = vmov 1326507024  }
  0x68   :  { %2496 = vmatprep.mubr.msk.f32.mxu1 %vm3072_vm0, %v3071_v0  ;;  %2736 = vmatpush3.bf16.msra.mxu1 %v3214_v23 }
  0x69   :  { %2737 = vmatprep.subr.bf16.mxu1 %v3073_v17 }
  0x6c   :  { %2739 = vmatpush3.bf16.msra.mxu1 %v3226_v28 }
  0x6d   :  { %2471 = vmatmul.mubr.f32.vlgmr.msra.gmra.mrb[0].mxu0 %v164_v7  ;;  %2740 = vmatprep.subr.bf16.mxu1 %v3073_v17  ;;  %v3077_v7 = vmov 2102212464  }
  0x6e   :  { %2474 = vmatpush3.msra.mxu0 %v98_v3  ;;  %2475 = vmatprep.mubr.msk.f32.mxu0 %vm3072_vm0, %v3071_v0 }
  0x6f   :  { %2478 = vmatprep.subr.mxu0 %v3071_v0 }
  0x75   :  { %2476 = vmatmul.mubr.f32.vlgmr.msra.gmra.mrb[0].mxu0 %v165_v9 }
  0x76   :  { %2479 = vmatpush3.msra.mxu0 %v176_v8  ;;  %2480 = vmatprep.mubr.msk.f32.mxu0 %vm3072_vm0, %v3071_v0 }
  0x77   :  { %2483 = vmatprep.subr.mxu0 %v3071_v0 }
  0x7d   :  { %2481 = vmatmul.mubr.f32.vlgmr.msra.gmra.mrb[0].mxu0 %v163_v5 }
  0x7e   :  { %2484 = vmatpush3.msra.mxu0 %v98_v3  ;;  %2485 = vmatprep.mubr.msk.f32.mxu0 %vm3072_vm0, %v3071_v0 }
  0x7f   :  { %2752 = vmatprep.subr.bf16.mxu0 %v3073_v17 }
  0x85   :  { %2486 = vmatmul.mubr.f32.vlgmr.msra.gmra.mrb[0].mxu0 %v163_v5 }
  0x86   :  { %2529 = vmatprep.mubr.msk.f32.mxu0 %vm3072_vm0, %v3071_v0  ;;  %2754 = vmatpush3.bf16.msra.mxu0 %v3214_v23 }
  0x87   :  { %2755 = vmatprep.subr.bf16.mxu0 %v3073_v17 }
  0x8a   :  { %2757 = vmatpush3.bf16.msra.mxu0 %v3226_v28 }
  0x8b   :  { %2764 = vmatprep.subr.bf16.mxu0 %v3073_v17 }
 0x13a   :  { %v169_v42 = vpop.f32.mrb[0].mxu1 }
 0x13b   :  { %v2462_v43 = vpop.f32.mrb[1].mxu1 }
 0x158   :  { %v539_v49 = vpop.f32.mrb[0].mxu0 }
 0x159   :  { %v3254_v50 = vadd.f32 %v539_v49, %v169_v42  ;;  %v2487_v51 = vpop.f32.mrb[1].mxu0 }
 0x15b   :  { %v546_v52 = vand.u32 2139095040, %v3254_v50  ;;  %v543_v56 = vand.u32 2147483647, %v3254_v50  ;;  %vm545_vm9 = vcmp.lt.s32.totalorder %v3254_v50, 0  ;;  %vm635_vm15 = vweird.f32 %v3254_v50 }
 0x15d   :  { %v547_v53 = vshrl.u32 %v546_v52, 23  ;;  %v550_v59 = vand.u32 8388607, %v543_v56  ;;  %vm544_vm10 = vcmp.le.f32.partialorder %v543_v56, 0.7853982  ;;  %v3282_v56 = vld [vmem:[#allocation7 + $0x18] sm:$0xff] }
 0x15f   :  { %v2322_v54 = vadd.s32 4294967169, %v547_v53  ;;  %v551_v15 = vor.u32 8388608, %v550_v59 }
 0x161   :  { %v553_v55 = vadd.s32 1, %v2322_v54  ;;  %v591_v36 = vshll.u32 %v551_v15, 8 }
 0x163   :  { %vm554_vm2 = vcmp.gt.s32.totalorder %v553_v55, 0 }
 0x164   :  { %v555_v57 = vsel %vm554_vm2, %v553_v55, 0 }
 0x165   :  { %v557_v58 = vand.u32 31, %v555_v57  ;;  %v556_v61 = vshrl.u32 %v555_v57, 5 }
 0x167   :  { %v558_v60 = vsub.s32 32, %v557_v58  ;;  %v560_v63 = vshll.u32 %v3074_v62, %v557_v58  ;;  %v563_v2 = vshll.u32 %v3075_v1, %v557_v58  ;;  %v566_v6 = vshll.u32 %v3076_v4, %v557_v58 }
 0x168   :  { %v569_v9 = vshll.u32 %v3077_v7, %v557_v58  ;;  %v572_v12 = vshll.u32 %v3078_v10, %v557_v58  ;;  %vm575_vm3 = vcmp.lt.s32.totalorder %v556_v61, 1  ;;  %vm578_vm4 = vcmp.lt.s32.totalorder %v556_v61, 4 }
 0x169   :  { %v561_v3 = vshrl.u32 %v3075_v1, %v558_v60  ;;  %v564_v5 = vshrl.u32 %v3076_v4, %v558_v60  ;;  %v567_v8 = vshrl.u32 %v3077_v7, %v558_v60  ;;  %v570_v11 = vshrl.u32 %v3078_v10, %v558_v60 }
 0x16a   :  { %v573_v14 = vshrl.u32 %v3079_v13, %v558_v60  ;;  %v559_v31 = vshrl.u32 %v3074_v62, %v558_v60  ;;  %vm577_vm5 = vcmp.lt.s32.totalorder %v556_v61, 3  ;;  %vm576_vm6 = vcmp.lt.s32.totalorder %v556_v61, 2 }
 0x16b   :  { %v562_v16 = vor.u32 %v561_v3, %v560_v63  ;;  %v565_v18 = vor.u32 %v564_v5, %v563_v2  ;;  %v568_v19 = vor.u32 %v567_v8, %v566_v6  ;;  %v571_v20 = vor.u32 %v570_v11, %v569_v9 }
 0x16c   :  { %v574_v21 = vor.u32 %v573_v14, %v572_v12 }
 0x16d   :  { %v580_v22 = vsel %vm578_vm4, %v568_v19, 2102212464  ;;  %v583_v29 = vsel %vm575_vm3, %v562_v16, %v565_v18  ;;  %v587_v30 = vsel %vm575_vm3, %v565_v18, %v568_v19  ;;  %v584_v32 = vsel %vm578_vm4, %v571_v20, 920167782 }
 0x16e   :  { %v588_v33 = vsel %vm578_vm4, %v574_v21, 1326507024  ;;  %v585_v34 = vsel %vm577_vm5, %v568_v19, %v584_v32  ;;  %v579_v38 = vsel %vm575_vm3, %v559_v31, %v562_v16  ;;  %v581_v39 = vsel %vm577_vm5, %v565_v18, %v580_v22  ;;  %v3276_v31 = vld [vmem:[#allocation7 + $0x8] sm:$0xff] }
 0x16f   :  { %v589_v35 = vsel %vm577_vm5, %v571_v20, %v588_v33  ;;  %v586_v40 = vsel %vm576_vm6, %v583_v29, %v585_v34  ;;  %v582_v52 = vsel %vm576_vm6, %v579_v38, %v581_v39  ;;  %v1254_v34 = vand.u32 4294901760, %v3276_v31 }
 0x170   :  { %v590_v41 = vsel %vm576_vm6, %v587_v30, %v589_v35  ;;  %v3263_v49 = vmul.u32.u64.low %v591_v36, %v586_v40  ;;  %v3264_v51 = vmul.u32.u64.high %v591_v36, %v586_v40, %v3263_v49  ;;  %v598_v54 = vmul.u32 %v591_v36, %v582_v52  ;;  %v3274_v30 = vld [vmem:[#allocation7] sm:$0xff] }
 0x171   :  { %v3260_v42 = vmul.u32.u64.low %v591_v36, %v590_v41  ;;  %v3261_v43 = vmul.u32.u64.high %v591_v36, %v590_v41, %v3260_v42  ;;  %v1251_v33 = vand.u32 4294901760, %v3274_v30  ;;  %v3280_v36 = vld [vmem:[#allocation7 + $0x10] sm:$0xff]  ;;  %vm1763_vm4 = vcmask 523264  }
 0x172   :  { %v601_v53 = vadd.s32 1, %v3264_v51  ;;  %v3292_v42 = vsub.f32 %v3276_v31, %v1254_v34  ;;  %v1750_v31 = vld [vmem:[#allocation10 + $0x10] sm:$0xff] }
 0x173   :  { %vm600_vm7 = vc.u32 %v3261_v43, %v3263_v49  ;;  %v599_v4 = vadd.s32 %v3263_v49, %v3261_v43  ;;  %v3287_v41 = vsub.f32 %v3274_v30, %v1251_v33  ;;  %v1257_v49 = vand.u32 4294901760, %v3280_v36 }
 0x174   :  { %v602_v55 = vsel %vm600_vm7, %v601_v53, %v3264_v51  ;;  %v1260_v51 = vand.u32 4294901760, %v3282_v56 }
 0x175   :  { %v603_v57 = vadd.s32 %v602_v55, %v598_v54  ;;  %v1332_v55 = vand.u32 4294901760, %v3287_v41 }
 0x176   :  { %v2774_v24 = vpack.c.bf16 %v1260_v51, %v1257_v49 }
 0x177   :  { %v604_v58 = vadd.s32 536870912, %v603_v57 }
 0x179   :  { %v605_v59 = vshrl.u32 %v604_v58, 30 }
 0x17b   :  { %v606_v60 = vshll.u32 %v605_v59, 30  ;;  %v629_v16 = vsub.s32 4, %v605_v59 }
 0x17d   :  { %v607_v61 = vsub.s32 %v603_v57, %v606_v60  ;;  %v630_v20 = vsel %vm545_vm9, %v629_v16, %v605_v59  ;;  %v1339_v57 = vand.u32 4294901760, %v3292_v42  ;;  %v3305_v59 = vsub.f32 %v3280_v36, %v1257_v49  ;;  %v1752_v36 = vld [vmem:[#allocation10 + $0x20] sm:$0xff] }
 0x17e   :  { %v632_v22 = vsel %vm544_vm10, 0, %v630_v20  ;;  %v3310_v60 = vsub.f32 %v3282_v56, %v1260_v51  ;;  %v1748_v20 = vld [vmem:[#allocation10] sm:$0xff]  ;;  %v1753_v56 = vld [vmem:[#allocation10 + $0x28] sm:$0xff] }
 0x17f   :  { %v609_v62 = vsub.s32 0, %v607_v61  ;;  %v743_v29 = vadd.s32 3, %v632_v22 }
 0x181   :  { %v2323_v63 = vmin.u32 %v609_v62, %v607_v61  ;;  %v744_v32 = vand.u32 3, %v743_v29 }
 0x183   :  { %v611_v1 = vclz %v2323_v63  ;;  %vm749_vm11 = vcmp.eq.s32.totalorder %v744_v32, 2  ;;  %vm746_vm12 = vcmp.eq.s32.totalorder %v744_v32, 0  ;;  %vm745_vm13 = vcmp.lt.s32.totalorder %v744_v32, 2  ;;  %v1751_v32 = vld [vmem:[#allocation10 + $0x18] sm:$0xff] }
 0x184   :  { %v1333_v63 = vsub.f32 %v3287_v41, %v1332_v55 }
 0x185   :  { %v2324_v2 = vadd.s32 4294967294, %v611_v1  ;;  %v1340_v1 = vsub.f32 %v3292_v42, %v1339_v57 }
 0x187   :  { %vm2325_vm8 = vcmp.lt.s32.totalorder %v2324_v2, 0 }
 0x188   :  { %v614_v3 = vsel %vm2325_vm8, 0, %v2324_v2  ;;  %v636_v2 = vand.u32 3, %v632_v22  ;;  %v1768_v22 = vand.u32 4294901760, %v1748_v20 }
 0x189   :  { %v615_v5 = vsub.s32 32, %v614_v3  ;;  %v619_v6 = vsub.s32 4294967266, %v614_v3  ;;  %v616_v7 = vshll.u32 %v607_v61, %v614_v3  ;;  %v1346_v3 = vand.u32 4294901760, %v3305_v59 }
 0x18a   :  { %vm638_vm1 = vcmp.eq.s32.totalorder %v636_v2, 0  ;;  %vm641_vm2 = vcmp.eq.s32.totalorder %v636_v2, 2  ;;  %vm637_vm3 = vcmp.lt.s32.totalorder %v636_v2, 2  ;;  %v3429_v51 = vsub.f32 %v1748_v20, %v1768_v22 }
 0x18b   :  { %v617_v8 = vshrl.u32 %v599_v4, %v615_v5  ;;  %v620_v9 = vadd.s32 127, %v619_v6  ;;  %v1353_v4 = vand.u32 4294901760, %v3310_v60 }
 0x18d   :  { %v618_v10 = vor.u32 %v617_v8, %v616_v7  ;;  %v621_v11 = vshll.u32 %v620_v9, 23  ;;  %v1334_v7 = vand.u32 4294901760, %v1333_v63  ;;  %v1341_v8 = vand.u32 4294901760, %v1340_v1 }
 0x18e   :  { %v1347_v9 = vsub.f32 %v3305_v59, %v1346_v3 }
 0x18f   :  { %v622_v12 = vor.u32 4788187, %v621_v11  ;;  %v625_v14 = vcvt.s32.f32 %v618_v10  ;;  %v1354_v10 = vsub.f32 %v3310_v60, %v1353_v4 }
 0x191   :  { %v623_v13 = vand.u32 2147483647, %v622_v12 }
 0x193   :  { %v626_v15 = vmul.f32 %v625_v14, %v623_v13  ;;  %v1348_v14 = vand.u32 4294901760, %v1347_v9 }
 0x195   :  { %v627_v18 = vxor.u32 2147483648, %v626_v15 }
 0x197   :  { %v628_v19 = vsel %vm545_vm9, %v627_v18, %v626_v15  ;;  %v1355_v15 = vand.u32 4294901760, %v1354_v10 }
 0x198   :  { %v631_v21 = vsel %vm544_vm10, %v3254_v50, %v628_v19  ;;  %v2798_v19 = vpack.c.bf16 %v1353_v4, %v1346_v3 }
 0x199   :  { %2918 = vcosq.f32 %v631_v21 }
 0x19a   :  { %2920 = vsinq.f32 %v631_v21  ;;  %v1749_v21 = vld [vmem:[#allocation10 + $0x8] sm:$0xff] }
 0x19b   :  { %v1771_v29 = vand.u32 4294901760, %v1749_v21 }
 0x19d   :  { %v3411_v30 = vpack.c.bf16 %v1771_v29, %v1768_v22 }
 0x1a3   :  { %v2919_v35 = vpop.eup %2918 }
 0x1a4   :  { %v2921_v38 = vpop.eup %2920  ;;  %v642_v39 = vxor.u32 2147483648, %v2919_v35 }
 0x1a5   :  { %v639_v40 = vxor.u32 2147483648, %v2921_v38 }
 0x1a6   :  { %v751_v43 = vsel %vm749_vm11, %v642_v39, %v2921_v38  ;;  %v643_v13 = vsel %vm641_vm2, %v642_v39, %v2921_v38  ;;  %v1780_v38 = vand.u32 4294901760, %v1752_v36  ;;  %v1783_v39 = vand.u32 4294901760, %v1753_v56 }
 0x1a7   :  { %v748_v52 = vsel %vm746_vm12, %v2919_v35, %v639_v40  ;;  %v640_v12 = vsel %vm638_vm1, %v2919_v35, %v639_v40 }
 0x1a8   :  { %v752_v53 = vsel %vm745_vm13, %v748_v52, %v751_v43  ;;  %v644_v16 = vsel %vm637_vm3, %v640_v12, %v643_v13  ;;  %v3423_v40 = vpack.c.bf16 %v1783_v39, %v1780_v38  ;;  %v3431_v52 = vsub.f32 %v1749_v21, %v1771_v29 }
 0x1a9   :  { %v753_v54 = vsel %vm635_vm15, nan, %v752_v53  ;;  %v645_v18 = vsel %vm635_vm15, nan, %v644_v16 }
 0x1aa   :  { %v760_v58 = vsel %vm758_vm14, %v753_v54, 0 }
 0x1ab   :  { %v3312_v61 = vand.u32 4294901760, %v760_v58 }
 0x1ad   :  { %v832_v62 = vsub.f32 %v760_v58, %v3312_v61  ;;  %v3441_v58 = vsub.f32 %v1753_v56, %v1783_v39 }
 0x1af   :  { %v833_v5 = vand.u32 4294901760, %v832_v62 }
 0x1b1   :  { %2530 = vmatmul.mubr.f32.vlgmr.msra.gmra.mrb[2].mxu0 %v833_v5  ;;  %v834_v6 = vsub.f32 %v832_v62, %v833_v5 }
 0x1b2   :  { %2766 = vmatpush3.bf16.msra.mxu0 %v3214_v23  ;;  %2551 = vmatprep.mubr.msk.f32.mxu0 %vm3072_vm0, %v3071_v0  ;;  %v2777_v23 = vpack.c.bf16 %v1341_v8, %v1334_v7 }
 0x1b3   :  { %2767 = vmatprep.subr.bf16.mxu0 %v3073_v17  ;;  %v835_v11 = vand.u32 4294901760, %v834_v6 }
 0x1b5   :  { %2497 = vmatmul.mubr.f32.vlgmr.msra.gmra.mrb[2].mxu1 %v835_v11 }
 0x1b6   :  { %2742 = vmatpush3.bf16.msra.mxu1 %v3240_v37  ;;  %2769 = vmatpush3.bf16.msra.mxu0 %v3226_v28  ;;  %v2780_v28 = vpack.c.bf16 %v1355_v15, %v1348_v14  ;;  %v1248_v37 = vsel %vm758_vm14, %v645_v18, 0 }
 0x1b7   :  { %2743 = vmatprep.subr.bf16.mxu1 %v3073_v17  ;;  %2776 = vmatprep.subr.bf16.mxu0 %v3073_v17  ;;  %v1319_v50 = vand.u32 4294901760, %v1248_v37 }
 0x1b8   :  { %2507 = vmatprep.mubr.msk.f32.mxu1 %vm3072_vm0, %v3071_v0 }
 0x1b9   :  { %2552 = vmatmul.mubr.f32.vlgmr.msra.gmra.mrb[4].mxu0 %v3312_v61  ;;  %v1320_v25 = vsub.f32 %v1248_v37, %v1319_v50 }
 0x1ba   :  { %2745 = vmatpush3.bf16.msra.mxu1 %v3244_v44  ;;  %2778 = vmatpush3.bf16.msra.mxu0 %v2777_v23  ;;  %v2771_v44 = vpack.c.bf16 %v1254_v34, %v1251_v33  ;;  %v1774_v33 = vand.u32 4294901760, %v1750_v31  ;;  %v1777_v34 = vand.u32 4294901760, %v1751_v32  ;;  %v1888_v23 = vand.u32 4294901760, %v3441_v58 }
 0x1bb   :  { %2746 = vmatprep.subr.bf16.mxu1 %v3073_v17  ;;  %2779 = vmatprep.subr.bf16.mxu0 %v3073_v17  ;;  %v1321_v26 = vand.u32 4294901760, %v1320_v25 }
 0x1bc   :  { %2573 = vmatprep.mubr.msk.f32.mxu0 %vm3072_vm0, %v3071_v0  ;;  %v3417_v35 = vpack.c.bf16 %v1777_v34, %v1774_v33  ;;  %v3435_v54 = vsub.f32 %v1750_v31, %v1774_v33  ;;  %v1889_v18 = vsub.f32 %v3441_v58, %v1888_v23 }
 0x1bd   :  { %2508 = vmatmul.mubr.f32.vlgmr.msra.gmra.mrb[4].mxu1 %v3312_v61  ;;  %v1322_v27 = vsub.f32 %v1320_v25, %v1321_v26 }
 0x1be   :  { %2748 = vmatpush3.bf16.msra.mxu1 %v2747_v45  ;;  %2781 = vmatpush3.bf16.msra.mxu0 %v2780_v28  ;;  %v2783_v45 = vpack.c.bf16 %v3292_v42, %v3287_v41  ;;  %v1754_v41 = vld [vmem:[#allocation10 + $0x30] sm:$0xff]  ;;  %v1755_v42 = vld [vmem:[#allocation10 + $0x38] sm:$0xff]  ;;  %v1867_v5 = vand.u32 4294901760, %v3435_v54  ;;  %v1890_v37 = vand.u32 4294901760, %v1889_v18 }
 0x1bf   :  { %2749 = vmatprep.subr.bf16.mxu1 %v3073_v17  ;;  %2788 = vmatprep.subr.bf16.mxu0 %v3073_v17  ;;  %v1786_v43 = vand.u32 4294901760, %v1754_v41  ;;  %v1789_v49 = vand.u32 4294901760, %v1755_v42 }
 0x1c0   :  { %2518 = vmatprep.mubr.msk.f32.mxu1 %vm3072_vm0, %v3071_v0  ;;  %v1868_v9 = vsub.f32 %v3435_v54, %v1867_v5 }
 0x1c1   :  { %2574 = vmatmul.mubr.f32.vlgmr.msra.gmra.mrb[6].mxu0 %v1319_v50  ;;  %v3433_v53 = vpack.c.bf16 %v1789_v49, %v1786_v43 }
 0x1c2   :  { %2751 = vmatpush3.bf16.msra.mxu1 %v2750_v46  ;;  %2790 = vmatpush3.bf16.msra.mxu0 %v2771_v44  ;;  %v1323_v46 = vand.u32 4294901760, %v1322_v27  ;;  %v1869_v11 = vand.u32 4294901760, %v1868_v9 }
 0x1c3   :  { %2758 = vmatprep.subr.bf16.mxu1 %v3073_v17  ;;  %2791 = vmatprep.subr.bf16.mxu0 %v3073_v17 }
 0x1c4   :  { %2595 = vmatprep.mubr.msk.f32.mxu0 %vm3072_vm0, %v3071_v0 }
 0x1c5   :  { %2519 = vmatmul.mubr.f32.vlgmr.msra.gmra.mrb[6].mxu1 %v832_v62  ;;  %v1860_v62 = vand.u32 4294901760, %v3431_v52 }
 0x1c6   :  { %2760 = vmatpush3.bf16.msra.mxu1 %v3250_v47  ;;  %2793 = vmatpush3.bf16.msra.mxu0 %v2774_v24  ;;  %v2786_v47 = vpack.c.bf16 %v3310_v60, %v3305_v59  ;;  %v3444_v59 = vsub.f32 %v1754_v41, %v1786_v43  ;;  %v3446_v60 = vsub.f32 %v1755_v42, %v1789_v49 }
 0x1c7   :  { %2761 = vmatprep.subr.bf16.mxu1 %v3073_v17  ;;  %2800 = vmatprep.subr.bf16.mxu0 %v3073_v17  ;;  %v1861_v2 = vsub.f32 %v3431_v52, %v1860_v62 }
 0x1c8   :  { %2540 = vmatprep.mubr.msk.f32.mxu1 %vm3072_vm0, %v3071_v0  ;;  %v2840_v21 = vpack.c.bf16 %v3446_v60, %v3444_v59 }
 0x1c9   :  { %2596 = vmatmul.mubr.f32.vlgmr.msra.gmra.mrb[8].mxu0 %v1321_v26  ;;  %v1862_v4 = vand.u32 4294901760, %v1861_v2 }
 0x1ca   :  { %2763 = vmatpush3.bf16.msra.mxu1 %v3252_v48  ;;  %2802 = vmatpush3.bf16.msra.mxu0 %v2771_v44  ;;  %v2795_v48 = vpack.c.bf16 %v1339_v57, %v1332_v55  ;;  %v3437_v55 = vsub.f32 %v1751_v32, %v1777_v34  ;;  %v3439_v57 = vsub.f32 %v1752_v36, %v1780_v38 }
 0x1cb   :  { %2770 = vmatprep.subr.bf16.mxu1 %v3073_v17  ;;  %2803 = vmatprep.subr.bf16.mxu0 %v3073_v17 }
 0x1cc   :  { %2617 = vmatprep.mubr.msk.f32.mxu0 %vm3072_vm0, %v3071_v0  ;;  %v1874_v6 = vand.u32 4294901760, %v3437_v55  ;;  %v1881_v13 = vand.u32 4294901760, %v3439_v57  ;;  %v2837_v20 = vpack.c.bf16 %v3441_v58, %v3439_v57 }
 0x1cd   :  { %2541 = vmatmul.mubr.f32.vlgmr.msra.gmra.mrb[8].mxu1 %v3312_v61  ;;  %v1853_v61 = vand.u32 4294901760, %v3429_v51 }
 0x1ce   :  { %2772 = vmatpush3.bf16.msra.mxu1 %v2771_v44  ;;  %2805 = vmatpush3.bf16.msra.mxu0 %v2774_v24  ;;  %v3461_v8 = vpack.c.bf16 %v1874_v6, %v1867_v5  ;;  %v1875_v10 = vsub.f32 %v3437_v55, %v1874_v6  ;;  %v3469_v15 = vpack.c.bf16 %v1888_v23, %v1881_v13  ;;  %v1895_v44 = vand.u32 4294901760, %v3444_v59 }
 0x1cf   :  { %2773 = vmatprep.subr.bf16.mxu1 %v3073_v17  ;;  %2562 = vmatprep.mubr.msk.f32.mxu1 %vm3072_vm0, %v3071_v0  ;;  %v3453_v63 = vpack.c.bf16 %v1860_v62, %v1853_v61  ;;  %v1854_v1 = vsub.f32 %v3429_v51, %v1853_v61  ;;  %v1882_v16 = vsub.f32 %v3439_v57, %v1881_v13 }
 0x1d0   :  { %2806 = vmatprep.subr.bf16.mxu0 %v3073_v17  ;;  %v1876_v12 = vand.u32 4294901760, %v1875_v10  ;;  %v1896_v26 = vsub.f32 %v3444_v59, %v1895_v44 }
 0x1d1   :  { %2618 = vmatmul.mubr.f32.vlgmr.msra.gmra.mrb[10].mxu0 %v1319_v50  ;;  %v1855_v3 = vand.u32 4294901760, %v1854_v1  ;;  %v1883_v28 = vand.u32 4294901760, %v1882_v16 }
 0x1d2   :  { %2775 = vmatpush3.bf16.msra.mxu1 %v2774_v24  ;;  %2636 = vmatprep.mubr.msk.f32.mxu0 %vm3072_vm0, %v3071_v0  ;;  %v3467_v14 = vpack.c.bf16 %v1876_v12, %v1869_v11 }
 0x1d3   :  { %2782 = vmatprep.subr.bf16.mxu1 %v3073_v17  ;;  %2808 = vmatpush3.bf16.msra.mxu0 %v3411_v30  ;;  %v3459_v7 = vpack.c.bf16 %v1862_v4, %v1855_v3  ;;  %v3475_v24 = vpack.c.bf16 %v1890_v37, %v1883_v28 }
 0x1d4   :  { %2809 = vmatprep.subr.bf16.mxu0 %v3073_v17 }
 0x1d5   :  { %2563 = vmatmul.mubr.f32.vlgmr.msra.gmra.mrb[10].mxu1 %v1323_v46 }
 0x1d6   :  { %2784 = vmatpush3.bf16.msra.mxu1 %v2783_v45  ;;  %2584 = vmatprep.mubr.msk.f32.mxu1 %vm3072_vm0, %v3071_v0  ;;  %v1897_v45 = vand.u32 4294901760, %v1896_v26  ;;  %v2330_v26 = vld [vmem:[%s3561_s4] ss:$0 sm:$0xff] }
 0x1d7   :  { %2785 = vmatprep.subr.bf16.mxu1 %v3073_v17  ;;  %2811 = vmatpush3.bf16.msra.mxu0 %v3417_v35 }
 0x1d8   :  { %2812 = vmatprep.subr.bf16.mxu0 %v3073_v17 }
 0x1da   :  { %2787 = vmatpush3.bf16.msra.mxu1 %v2786_v47 }
 0x1db   :  { %2794 = vmatprep.subr.bf16.mxu1 %v3073_v17  ;;  %2814 = vmatpush3.bf16.msra.mxu0 %v3423_v40 }
 0x1dc   :  { %2815 = vmatprep.subr.bf16.mxu0 %v3073_v17 }
 0x1dd   :  { %2585 = vmatmul.mubr.f32.vlgmr.msra.gmra.mrb[12].mxu1 %v1320_v25 }
 0x1de   :  { %2796 = vmatpush3.bf16.msra.mxu1 %v2795_v48  ;;  %2606 = vmatprep.mubr.msk.f32.mxu1 %vm3072_vm0, %v3071_v0  ;;  %v2831_v48 = vpack.c.bf16 %v3431_v52, %v3429_v51 }
 0x1df   :  { %2797 = vmatprep.subr.bf16.mxu1 %v3073_v17  ;;  %2817 = vmatpush3.bf16.msra.mxu0 %v3433_v53 }
 0x1e0   :  { %2818 = vmatprep.subr.bf16.mxu0 %v3073_v17 }
 0x1e2   :  { %2799 = vmatpush3.bf16.msra.mxu1 %v2798_v19  ;;  %v2834_v19 = vpack.c.bf16 %v3437_v55, %v3435_v54 }
 0x1e3   :  { %2842 = vmatprep.subr.bf16.mxu1 %v3073_v17 }
 0x1e5   :  { %2607 = vmatmul.mubr.f32.vlgmr.msra.gmra.mrb[14].mxu1 %v1319_v50  ;;  %v1902_v50 = vand.u32 4294901760, %v3446_v60 }
 0x1e6   :  { %2693 = vmatprep.mubr.msk.f32.mxu1 %vm3072_vm0, %v3071_v0  ;;  %2844 = vmatpush3.bf16.msra.mxu1 %v3411_v30 }
 0x1e7   :  { %2845 = vmatprep.subr.bf16.mxu1 %v3073_v17  ;;  %v3477_v25 = vpack.c.bf16 %v1902_v50, %v1895_v44  ;;  %v1903_v27 = vsub.f32 %v3446_v60, %v1902_v50 }
 0x1e9   :  { %v1904_v46 = vand.u32 4294901760, %v1903_v27 }
 0x1ea   :  { %2847 = vmatpush3.bf16.msra.mxu1 %v3417_v35 }
 0x1eb   :  { %2848 = vmatprep.subr.bf16.mxu1 %v3073_v17  ;;  %v3481_v47 = vpack.c.bf16 %v1904_v46, %v1897_v45 }
 0x1ee   :  { %2850 = vmatpush3.bf16.msra.mxu1 %v3423_v40 }
 0x1ef   :  { %2851 = vmatprep.subr.bf16.mxu1 %v3073_v17 }
 0x1f2   :  { %2853 = vmatpush3.bf16.msra.mxu1 %v3433_v53 }
 0x1f3   :  { %2854 = vmatprep.subr.bf16.mxu1 %v3073_v17 }
 0x284   :  { %v1085_v22 = vpop.f32.mrb[2].mxu0 }
 0x285   :  { %v2531_v29 = vpop.f32.mrb[3].mxu0 }
 0x288   :  { %v837_v31 = vpop.f32.mrb[2].mxu1 }
 0x289   :  { %v2498_v32 = vpop.f32.mrb[3].mxu1 }
 0x28c   :  { %v1243_v33 = vpop.f32.mrb[4].mxu0 }
 0x28d   :  { %v2553_v34 = vpop.f32.mrb[5].mxu0 }
 0x290   :  { %v928_v36 = vpop.f32.mrb[4].mxu1 }
 0x291   :  { %v929_v56 = vadd.f32 %v928_v36, %v837_v31  ;;  %v2509_v38 = vpop.f32.mrb[5].mxu1 }
 0x294   :  { %v1416_v39 = vpop.f32.mrb[6].mxu0 }
 0x295   :  { %v2575_v41 = vpop.f32.mrb[7].mxu0 }
 0x298   :  { %v1008_v42 = vpop.f32.mrb[6].mxu1 }
 0x299   :  { %v1009_v43 = vadd.f32 %v1008_v42, %v929_v56  ;;  %v2520_v49 = vpop.f32.mrb[7].mxu1 }
 0x29b   :  { %v1086_v61 = vadd.f32 %v1085_v22, %v1009_v43 }
 0x29c   :  { %v1573_v62 = vpop.f32.mrb[8].mxu0 }
 0x29d   :  { %v2597_v1 = vpop.f32.mrb[9].mxu0 }
 0x2a0   :  { %v1168_v2 = vpop.f32.mrb[8].mxu1 }
 0x2a1   :  { %v1169_v3 = vadd.f32 %v1168_v2, %v1086_v61  ;;  %v2542_v4 = vpop.f32.mrb[9].mxu1 }
 0x2a3   :  { %v1244_v5 = vadd.f32 %v1243_v33, %v1169_v3 }
 0x2a4   :  { %v1731_v6 = vpop.f32.mrb[10].mxu0 }
 0x2a5   :  { %v2619_v9 = vpop.f32.mrb[11].mxu0 }
 0x2a8   :  { %v1325_v10 = vpop.f32.mrb[10].mxu1 }
 0x2a9   :  { %v1326_v11 = vadd.f32 %v1325_v10, %v1244_v5  ;;  %v2564_v12 = vpop.f32.mrb[11].mxu1 }
 0x2ab   :  { %v1417_v13 = vadd.f32 %v1416_v39, %v1326_v11 }
 0x2b0   :  { %v1496_v23 = vpop.f32.mrb[12].mxu1 }
 0x2b1   :  { %v1497_v16 = vadd.f32 %v1496_v23, %v1417_v13  ;;  %v2586_v18 = vpop.f32.mrb[13].mxu1 }
 0x2b3   :  { %v1574_v28 = vadd.f32 %v1573_v62, %v1497_v16 }
 0x2b8   :  { %v1656_v37 = vpop.f32.mrb[14].mxu1 }
 0x2b9   :  { %v1657_v44 = vadd.f32 %v1656_v37, %v1574_v28  ;;  %v2608_v50 = vpop.f32.mrb[15].mxu1 }
 0x2bb   :  { %v1732_v27 = vadd.f32 %v1731_v6, %v1657_v44 }
 0x2bd   :  { %v1742_v45 = vadd.f32 %v2330_v26, %v1732_v27 }
 0x2bf   :  { %v1744_v46 = vmul.f32 0.70710677, %v1742_v45  ;;  %v1743_v29 = vmul.f32 0.5, %v1742_v45 }
 0x2c1   :  { %2922 = verf.f32 %v1744_v46 }
 0x2cb   :  { %v2923_v22 = vpop.eup %2922 }
 0x2cc   :  { %v1746_v31 = vadd.f32 1.0, %v2923_v22 }
 0x2ce   :  { %v1747_v32 = vmul.f32 %v1746_v31, %v1743_v29 }
 0x2d0   :  { %v1765_v33 = vsel %vm1763_vm4, %v1747_v32, 0 }
 0x2d1   :  { %v1840_v34 = vand.u32 4294901760, %v1765_v33 }
 0x2d3   :  { %v1841_v36 = vsub.f32 %v1765_v33, %v1840_v34 }
 0x2d5   :  { %v1842_v56 = vand.u32 4294901760, %v1841_v36 }
 0x2d7   :  { %2694 = vmatmul.mubr.f32.vlgmr.msra.gmra.mrb[16].mxu1 %v1842_v56  ;;  %v1843_v38 = vsub.f32 %v1841_v36, %v1842_v56 }
 0x2d8   :  { %2856 = vmatpush3.bf16.msra.mxu1 %v3453_v63  ;;  %2712 = vmatprep.mubr.msk.f32.mxu1 %vm3072_vm0, %v3071_v0 }
 0x2d9   :  { %2857 = vmatprep.subr.bf16.mxu1 %v3073_v17  ;;  %v1844_v39 = vand.u32 4294901760, %v1843_v38 }
 0x2db   :  { %2637 = vmatmul.mubr.f32.vlgmr.msra.gmra.mrb[12].mxu0 %v1844_v39 }
 0x2dc   :  { %2820 = vmatpush3.bf16.msra.mxu0 %v3459_v7  ;;  %2859 = vmatpush3.bf16.msra.mxu1 %v3461_v8 }
 0x2dd   :  { %2821 = vmatprep.subr.bf16.mxu0 %v3073_v17  ;;  %2860 = vmatprep.subr.bf16.mxu1 %v3073_v17 }
 0x2de   :  { %2655 = vmatprep.mubr.msk.f32.mxu0 %vm3072_vm0, %v3071_v0 }
 0x2e0   :  { %2823 = vmatpush3.bf16.msra.mxu0 %v3467_v14  ;;  %2862 = vmatpush3.bf16.msra.mxu1 %v3469_v15 }
 0x2e1   :  { %2824 = vmatprep.subr.bf16.mxu0 %v3073_v17  ;;  %2863 = vmatprep.subr.bf16.mxu1 %v3073_v17 }
 0x2e4   :  { %2826 = vmatpush3.bf16.msra.mxu0 %v3475_v24  ;;  %2865 = vmatpush3.bf16.msra.mxu1 %v3477_v25 }
 0x2e5   :  { %2827 = vmatprep.subr.bf16.mxu0 %v3073_v17  ;;  %2866 = vmatprep.subr.bf16.mxu1 %v3073_v17 }
 0x2e7   :  { %2713 = vmatmul.mubr.f32.vlgmr.msra.gmra.mrb[16].mxu1 %v1840_v34 }
 0x2e8   :  { %2829 = vmatpush3.bf16.msra.mxu0 %v3481_v47  ;;  %2868 = vmatpush3.bf16.msra.mxu1 %v3411_v30 }
 0x2e9   :  { %2830 = vmatprep.subr.bf16.mxu0 %v3073_v17  ;;  %2869 = vmatprep.subr.bf16.mxu1 %v3073_v17 }
 0x2ea   :  { %2731 = vmatprep.mubr.msk.f32.mxu1 %vm3072_vm0, %v3071_v0 }
 0x2eb   :  { %2656 = vmatmul.mubr.f32.vlgmr.msra.gmra.mrb[12].mxu0 %v1840_v34 }
 0x2ec   :  { %2832 = vmatpush3.bf16.msra.mxu0 %v2831_v48  ;;  %2871 = vmatpush3.bf16.msra.mxu1 %v3417_v35  ;;  %v2331_v35 = vld [vmem:[%s3563_s6] ss:$0 sm:$0xff] }
 0x2ed   :  { %2833 = vmatprep.subr.bf16.mxu0 %v3073_v17  ;;  %2872 = vmatprep.subr.bf16.mxu1 %v3073_v17 }
 0x2ee   :  { %2674 = vmatprep.mubr.msk.f32.mxu0 %vm3072_vm0, %v3071_v0 }
 0x2f0   :  { %2835 = vmatpush3.bf16.msra.mxu0 %v2834_v19  ;;  %2874 = vmatpush3.bf16.msra.mxu1 %v3423_v40 }
 0x2f1   :  { %2836 = vmatprep.subr.bf16.mxu0 %v3073_v17  ;;  %2875 = vmatprep.subr.bf16.mxu1 %v3073_v17 }
 0x2f4   :  { %2838 = vmatpush3.bf16.msra.mxu0 %v2837_v20  ;;  %2877 = vmatpush3.bf16.msra.mxu1 %v3433_v53 }
 0x2f5   :  { %2839 = vmatprep.subr.bf16.mxu0 %v3073_v17 }
 0x2f7   :  { %2732 = vmatmul.mubr.f32.vlgmr.msra.gmra.mrb[16].mxu1 %v1840_v34 }
 0x2f8   :  { %2841 = vmatpush3.bf16.msra.mxu0 %v2840_v21 }
 0x2fb   :  { %2675 = vmatmul.mubr.f32.vlgmr.msra.gmra.mrb[12].mxu0 %v1841_v36 }
 0x3ca   :  { %v2300_v0 = vpop.f32.mrb[16].mxu1 }
 0x3cb   :  { %v2733_v30 = vpop.f32.mrb[17].mxu1 }
 0x3ce   :  { %v2045_v40 = vpop.f32.mrb[12].mxu0 }
 0x3cf   :  { %v2879_v51 = vadd.f32 %v2331_v35, %v2045_v40  ;;  %v2676_v52 = vpop.f32.mrb[13].mxu0 }
 0x3d1   :  { %v2880_v53 = vadd.f32 %v2879_v51, %v2300_v0 }
 0x3d3   :  { %2304 = vst.msk [vmem:[#allocation11] sm:$0xff] %vm1763_vm4, %v2880_v53 }
 0x3d4   :  { %3045 = shalt.err (!%p3042_p2)
}
 0x3d5   :  { %s3046_s6 = scalar_lea.hbm %s3564_s7, 128 }
 0x3d6   :  { %p3047_p3 = scmp.ne.s32.totalorder %s3564_s7, %s3046_s6  ;;  %p3050_p4 = scmp.lt.u32.totalorder %s3046_s6, %s3564_s7 }
 0x3d8   :  { %p3052_p5 = pnand %p3050_p4, %p3047_p3 }
 0x3da   :  { %3055 = shalt.err (!%p3052_p5)
}
 0x3db   :  { %2314 = dma.vmem_to_hbm [thread:$0]  %s2312_s14, 128, %s3564_s7, [#allocation4]  }
 0x3dc   :  { %3062 = dma.done.wait [#allocation4], 128  }
 0x3dd   :  { %3063 = vsyncadd [#allocation4], 4294967168 }
 0x3de   :  { %2318 = vsyncpa [#allocation3], 1 }
 0x3df   :  { %2319 = vsyncpa [#allocation6], 1 }
 0x3e0   :  { %2320 = vsyncpa [#allocation9], 1 }
 0x3e1   :  { %2321 = vsyncpa [#allocation4], 1 }

</bundles_post_ra>
